<compile_context>
chip_gen: v5e
topology: v5e:2x2
jax: 0.10.0
libtpu: 0.0.40
codegen_flags: <defaults>
</compile_context>

<pallas_src>
import jax
import jax.numpy as jnp
from jax import lax
from jax.experimental import pallas as pl
from jax.experimental.pallas import tpu as pltpu


def _round_up(x, m):
    return ((x + m - 1) // m) * m


# --------------------------------------------------------------------------- parameter packing
def pack_fcnet_params(params, *, lane=None, row_align=16, dtype=jnp.bfloat16):
    """Pack w1,b1,w2,b2,w3,b3 into one [rows, L] bf16 buffer, zero-padded to L lanes.

    Weights are stored transposed ([in, out]). Padded lanes/rows are zero, so the padded
    matmuls are numerically identical to the unpadded ones.
    Returns (packed, meta) where meta holds static row offsets / dims for the kernel.
    """
    w1, b1 = params["w1"], params["b1"]
    w2, b2 = params["w2"], params["b2"]
    w3, b3 = params["w3"], params["b3"]
    d_in, d_h = w1.shape
    d_out = w2.shape[1]
    assert w2.shape[0] == d_h and w3.shape == (d_out, 1)

    L = lane if lane is not None else max(128, _round_up(max(d_h, d_out), 128))

    w1_off = 0
    b1_off = _round_up(w1_off + d_in, row_align)
    w2_off = _round_up(b1_off + 1, row_align)
    b2_off = _round_up(w2_off + L, row_align)
    w3_off = _round_up(b2_off + 1, row_align)
    b3_off = _round_up(w3_off + 1, row_align)
    rows = _round_up(b3_off + 1, row_align)

    p = jnp.zeros((rows, L), dtype)
    p = p.at[w1_off:w1_off + d_in, :d_h].set(w1.astype(dtype))
    p = p.at[b1_off, :d_h].set(b1.reshape(-1).astype(dtype))
    p = p.at[w2_off:w2_off + d_h, :d_out].set(w2.astype(dtype))
    p = p.at[b2_off, :d_out].set(b2.reshape(-1).astype(dtype))
    p = p.at[w3_off, :d_out].set(w3.reshape(-1).astype(dtype))
    # b3 broadcast across all lanes so the kernel can load a full (1, L) row (no 1-lane ref slice).
    p = p.at[b3_off, :].set(b3.astype(dtype).reshape(()))

    meta = dict(d_in=d_in, d_h=d_h, d_out=d_out, lane=L,
                w1_off=w1_off, b1_off=b1_off, w2_off=w2_off,
                b2_off=b2_off, w3_off=w3_off, b3_off=b3_off)
    return p, meta


# --------------------------------------------------------------------------------------- kernel
def _make_fcnet_kernel(meta):
    d_in, L = meta["d_in"], meta["lane"]
    w1_off, b1_off = meta["w1_off"], meta["b1_off"]
    w2_off, b2_off = meta["w2_off"], meta["b2_off"]
    w3_off, b3_off = meta["w3_off"], meta["b3_off"]

    def kernel(x_ref, p_ref, o_ref):
        x = x_ref[...]                                              # (tile_b, d_in) bf16
        # fc1: bf16 MXU matmul, f32 accumulate; bias + ReLU in f32 (v5e-safe).
        w1 = p_ref[w1_off:w1_off + d_in, :]                         # (d_in, L) bf16
        h1 = jnp.dot(x, w1, preferred_element_type=jnp.float32)
        b1 = p_ref[b1_off:b1_off + 1, :].astype(jnp.float32)
        h1 = jnp.maximum(h1 + b1, 0.0)
        # fc2: padded lanes/rows are zero -> identical result to the unpadded matmul.
        w2 = p_ref[w2_off:w2_off + L, :]                            # (L, L) bf16
        h2 = jnp.dot(h1.astype(jnp.bfloat16), w2,
                     preferred_element_type=jnp.float32)
        b2 = p_ref[b2_off:b2_off + 1, :].astype(jnp.float32)
        h2 = jnp.maximum(h2 + b2, 0.0)                              # (tile_b, L); lanes>=d_out are 0
        # fc3 (out dim 1): VPU multiply + XLU lane reduction instead of an N=1 MXU matmul.
        w3 = p_ref[w3_off:w3_off + 1, :].astype(jnp.float32)        # (1, L), zero past d_out
        h3 = jnp.sum(h2 * w3, axis=-1, keepdims=True)               # (tile_b, 1) f32
        b3 = p_ref[b3_off:b3_off + 1, :].astype(jnp.float32)[:, :1]  # (1, 1)
        o_ref[...] = (h3 + b3).astype(o_ref.dtype)

    return kernel


# -------------------------------------------------------------------------------------- wrapper
def fcnet_forward(x, packed, meta, *, block_b=512):
    """x: [B, input_size] f32/bf16. packed/meta from pack_fcnet_params."""
    B, d_in = x.shape
    assert d_in == meta["d_in"]

    tile_b = min(block_b, _round_up(max(B, 1), 16))     # multiple of 16 (bf16 sublane pack)
    x = x.astype(jnp.bfloat16)
    Bp = _round_up(B, tile_b)
    if Bp != B:
        x = jnp.pad(x, ((0, Bp - B), (0, 0)))

    out = pl.pallas_call(
        _make_fcnet_kernel(meta),
        out_shape=jax.ShapeDtypeStruct((Bp, 1), jnp.float32),
        grid=(Bp // tile_b,),
        in_specs=[
            pl.BlockSpec((tile_b, d_in), lambda i: (i, 0)),   # batch-tiled activations (pipelined)
            pl.BlockSpec(packed.shape, lambda i: (0, 0)),     # packed params: VMEM-resident
        ],
        out_specs=pl.BlockSpec((tile_b, 1), lambda i: (i, 0)),
        compiler_params=pltpu.CompilerParams(
            dimension_semantics=("parallel",),   # megacore split on v7x; no-op on v5e/v6e
            vmem_limit_bytes=32 * 1024 * 1024,
        ),
    )(x, packed)
    return out[:B]


# ----------------------------------------------------------------------------------------- init
def init_fcnet_params(key, input_size, input_fc2_size, out_size):
    """Mimics nn.Linear init (uniform +-1/sqrt(fan_in)); weights stored transposed [in, out]."""
    ks = jax.random.split(key, 6)

    def linear(kw, kb, fan_in, fan_out):
        bound = 1.0 / jnp.sqrt(jnp.float32(fan_in))
        w = jax.random.uniform(kw, (fan_in, fan_out), jnp.float32, -bound, bound)
        b = jax.random.uniform(kb, (fan_out,), jnp.float32, -bound, bound)
        return w, b

    w1, b1 = linear(ks[0], ks[1], input_size, input_fc2_size)
    w2, b2 = linear(ks[2], ks[3], input_fc2_size, out_size)
    w3, b3 = linear(ks[4], ks[5], out_size, 1)
    return {"w1": w1, "b1": b1, "w2": w2, "b2": b2, "w3": w3, "b3": b3}


if __name__ == "__main__":
    key = jax.random.PRNGKey(0)
    k_x, k_p = jax.random.split(key)

    # Small shapes consistent with the module; B=200 exercises batch tiling + padding (grid=2).
    B, input_size, input_fc2_size, out_size = 200, 32, 64, 16

    x = jax.random.normal(k_x, (B, input_size), jnp.float32)
    params = init_fcnet_params(k_p, input_size, input_fc2_size, out_size)
    packed, meta = pack_fcnet_params(params)

    out = fcnet_forward(x, packed, meta, block_b=128)
    out = jax.block_until_ready(out)
    assert out.shape == (B, 1)

    hp = lax.Precision.HIGHEST
    bf = lambda a: a.astype(jnp.bfloat16).astype(jnp.float32)

    # Reference 1: same bf16-rounded operands, f32 math -> matches kernel numerics closely.
    h1 = jnp.maximum(jnp.dot(bf(x), bf(params["w1"]), precision=hp) + bf(params["b1"]), 0.0)
    h1 = bf(h1)  # kernel rounds the fc1 activation to bf16 before fc2
    h2 = jnp.maximum(jnp.dot(h1, bf(params["w2"]), precision=hp) + bf(params["b2"]), 0.0)
    ref_bf16 = jnp.dot(h2, bf(params["w3"]), precision=hp) + bf(params["b3"])
    assert jnp.allclose(out, ref_bf16, atol=1e-3, rtol=1e-3)

    # Reference 2: pure f32 (original PyTorch semantics), looser tolerance due to bf16 operands.
    h1 = jnp.maximum(jnp.dot(x, params["w1"], precision=hp) + params["b1"], 0.0)
    h2 = jnp.maximum(jnp.dot(h1, params["w2"], precision=hp) + params["b2"], 0.0)
    ref_f32 = jnp.dot(h2, params["w3"], precision=hp) + params["b3"]
    assert jnp.allclose(out, ref_f32, atol=3e-2, rtol=3e-2)

    print("KERNEL_OK")
</pallas_src>

<mosaic_0001>
module attributes {stable_mosaic.version = 11 : i64} {
  func.func @kernel(%arg0: i32, %arg1: memref<128x32xbf16, #tpu.memory_space<vmem>>, %arg2: memref<224x128xbf16, #tpu.memory_space<vmem>>, %arg3: memref<128x1xf32, #tpu.memory_space<vmem>>) attributes {dimension_semantics = [#tpu.dimension_semantics<parallel>], iteration_bounds = array<i64: 2>, scalar_prefetch = 0 : i64, scratch_operands = 0 : i64, tpu.core_type = #tpu.core_type<tc>, window_params = [{transform_indices = @transform_0, window_bounds = array<i64: 128, 32>}, {pipeline_mode = #tpu.pipeline_mode<synchronous>, transform_indices = @transform_1, window_bounds = array<i64: 224, 128>}, {transform_indices = @transform_2, window_bounds = array<i64: 128, 1>}]} {
    %c0 = arith.constant 0 : index
    %c0_0 = arith.constant 0 : index
    %0 = vector.load %arg1[%c0, %c0_0] : memref<128x32xbf16, #tpu.memory_space<vmem>>, vector<128x32xbf16>
    %c0_1 = arith.constant 0 : index
    %c0_2 = arith.constant 0 : index
    %1 = vector.load %arg2[%c0_1, %c0_2] : memref<224x128xbf16, #tpu.memory_space<vmem>>, vector<32x128xbf16>
    %cst = arith.constant dense<0.000000e+00> : vector<128x128xf32>
    %2 = tpu.matmul %0, %1, %cst {dimension_numbers = #tpu.dot_dimension_numbers<[1], [0], [0], [1], [0, 0, 1, 1], [], []>} : vector<128x32xbf16>, vector<32x128xbf16>, vector<128x128xf32> -> vector<128x128xf32>
    %c32 = arith.constant 32 : index
    %c0_3 = arith.constant 0 : index
    %3 = vector.load %arg2[%c32, %c0_3] : memref<224x128xbf16, #tpu.memory_space<vmem>>, vector<1x128xbf16>
    %4 = arith.extf %3 : vector<1x128xbf16> to vector<1x128xf32>
    %5 = vector.broadcast %4 : vector<1x128xf32> to vector<128x128xf32>
    %6 = arith.addf %2, %5 : vector<128x128xf32>
    %cst_4 = arith.constant 0.000000e+00 : f32
    %7 = vector.broadcast %cst_4 : f32 to vector<128x128xf32>
    %8 = arith.maximumf %6, %7 : vector<128x128xf32>
    %c48 = arith.constant 48 : index
    %c0_5 = arith.constant 0 : index
    %9 = vector.load %arg2[%c48, %c0_5] : memref<224x128xbf16, #tpu.memory_space<vmem>>, vector<128x128xbf16>
    %10 = arith.truncf %8 : vector<128x128xf32> to vector<128x128xbf16>
    %cst_6 = arith.constant dense<0.000000e+00> : vector<128x128xf32>
    %11 = tpu.matmul %10, %9, %cst_6 {dimension_numbers = #tpu.dot_dimension_numbers<[1], [0], [0], [1], [0, 0, 1, 1], [], []>} : vector<128x128xbf16>, vector<128x128xbf16>, vector<128x128xf32> -> vector<128x128xf32>
    %c176 = arith.constant 176 : index
    %c0_7 = arith.constant 0 : index
    %12 = vector.load %arg2[%c176, %c0_7] : memref<224x128xbf16, #tpu.memory_space<vmem>>, vector<1x128xbf16>
    %13 = arith.extf %12 : vector<1x128xbf16> to vector<1x128xf32>
    %14 = vector.broadcast %13 : vector<1x128xf32> to vector<128x128xf32>
    %15 = arith.addf %11, %14 : vector<128x128xf32>
    %cst_8 = arith.constant 0.000000e+00 : f32
    %16 = vector.broadcast %cst_8 : f32 to vector<128x128xf32>
    %17 = arith.maximumf %15, %16 : vector<128x128xf32>
    %c192 = arith.constant 192 : index
    %c0_9 = arith.constant 0 : index
    %18 = vector.load %arg2[%c192, %c0_9] : memref<224x128xbf16, #tpu.memory_space<vmem>>, vector<1x128xbf16>
    %19 = arith.extf %18 : vector<1x128xbf16> to vector<1x128xf32>
    %20 = vector.broadcast %19 : vector<1x128xf32> to vector<128x128xf32>
    %21 = arith.mulf %17, %20 : vector<128x128xf32>
    %cst_10 = arith.constant dense<0.000000e+00> : vector<128xf32>
    %22 = vector.multi_reduction <add>, %21, %cst_10 [1] : vector<128x128xf32> to vector<128xf32>
    %23 = vector.shape_cast %22 : vector<128xf32> to vector<128x1xf32>
    %c208 = arith.constant 208 : index
    %c0_11 = arith.constant 0 : index
    %24 = vector.load %arg2[%c208, %c0_11] : memref<224x128xbf16, #tpu.memory_space<vmem>>, vector<1x128xbf16>
    %25 = arith.extf %24 : vector<1x128xbf16> to vector<1x128xf32>
    %26 = vector.extract_strided_slice %25 {offsets = [0, 0], sizes = [1, 1], strides = [1, 1]} : vector<1x128xf32> to vector<1x1xf32>
    %27 = vector.broadcast %26 : vector<1x1xf32> to vector<128x1xf32>
    %28 = arith.addf %23, %27 : vector<128x1xf32>
    %c0_12 = arith.constant 0 : index
    %c0_13 = arith.constant 0 : index
    %29 = vector.load %arg3[%c0_12, %c0_13] : memref<128x1xf32, #tpu.memory_space<vmem>>, vector<128x1xf32>
    tpu.vector_store %arg3[%c0_12, %c0_13], %28 {strides = array<i32>} : memref<128x1xf32, #tpu.memory_space<vmem>>, vector<128x1xf32>,
    return
  }
  func.func @transform_0(%arg0: i32) -> (i32, i32) {
    %c0_i32 = arith.constant 0 : i32
    %c0_i32_0 = arith.constant 0 : i32
    return %arg0, %c0_i32 : i32, i32
  }
  func.func @transform_1(%arg0: i32) -> (i32, i32) {
    %c0_i32 = arith.constant 0 : i32
    %c0_i32_0 = arith.constant 0 : i32
    %c0_i32_1 = arith.constant 0 : i32
    return %c0_i32, %c0_i32_0 : i32, i32
  }
  func.func @transform_2(%arg0: i32) -> (i32, i32) {
    %c0_i32 = arith.constant 0 : i32
    %c0_i32_0 = arith.constant 0 : i32
    return %arg0, %c0_i32 : i32, i32
  }
}

</mosaic_0001>

<bundles_post_ra>
// kernel: tpu_custom_call.1
= control target key start
LH: loop header
LB: loop body
LE: loop exit
PB: predicated region body
PF: predicated region fallthrough
CT: control target
= control target key end

     0   :  { %s746_s9 = smov 0   ;;  %s887_s0 = inlined_call_operand.vmem [shape: bf16[256,32], index: 0, kind: input, shape index: {}]   ;;  %s888_s1 = inlined_call_operand.vmem [shape: bf16[224,128], index: 1, kind: input, shape index: {}]   ;;  %s889_s2 = inlined_call_operand.vmem [shape: f32[256,1], index: 2, kind: output, shape index: {}]  }
   0x1 LB: > { %s596_s10 = sadd.s32 4294967295, %s729_s9   ;;  %p600_p0 = scmp.ge.s32.totalorder %s729_s9, 1  ;;  %s729_s9 = sphi %s746_s9, %s12_s9  }
   0x2   : > { %p113_p1 = scmp.lt.s32.totalorder %s729_s9, 3 }
   0x4   : > { %p114_p2 = pnand %p600_p0, %p113_p1 }
   0x5   : > { %s601_s13 = sshll.u32 (!%p114_p2), %s596_s10, 4 }
   0x6   : > { %117 = sbr.rel (%p114_p2) target bundleno = 536 (0x218), region = 28  ;;  %p136_p3 = scmp.lt.s32.totalorder (!%p114_p2), %s601_s13, 31 }
   0xb   : > { %v696_v0 = vld [vmem:[%s888_s1 + $0x8] sm:$0xff]  ;;  %v695_v1 = vld [vmem:[%s888_s1] sm:$0xff]  ;;  %s891_s13 = smov (!%p136_p3, %s601_s13), 31  ;;  %vm223_vm0 = vcmask 261120   ;;  %v704_v6 = vld [vmem:[%s888_s1 + $0x50] sm:$0xff]  ;;  %vm523_vm1 = vcmask 7168  }
   0xc   : > { %254 = vmatpush.bf16.msra.mxu0 %v696_v0  ;;  %705 = vmatpush.bf16.msra.mxu3 %v696_v0  ;;  %s602_s16 = sshll.u32 %s891_s13, 2  ;;  %v703_v7 = vld [vmem:[%s888_s1 + $0x48] sm:$0xff]  ;;  %v702_v8 = vld [vmem:[%s888_s1 + $0x40] sm:$0xff]  ;;  %v701_v10 = vld [vmem:[%s888_s1 + $0x38] sm:$0xff]  ;;  %s604_s18 = sshll.u32 %s891_s13, 3 }
   0xd   : > { %s139_s19 = scalar_lea.vmem %s887_s0, %s602_s16  ;;  %388 = vmatpush.bf16.msra.mxu1 %v704_v6  ;;  %707 = vmatpush.bf16.msra.mxu2 %v704_v6  ;;  %v700_v14 = vld [vmem:[%s888_s1 + $0x30] sm:$0xff]  ;;  %v699_v15 = vld [vmem:[%s888_s1 + $0x28] sm:$0xff]  ;;  %v698_v16 = vld [vmem:[%s888_s1 + $0x20] sm:$0xff]  ;;  %s847_s21 = scalar_lea.vmem %s889_s2, %s604_s18 }
   0xe   : > { %v687_v2 = vld [vmem:[%s139_s19] sm:$0xff]  ;;  %v688_v3 = vld [vmem:[%s139_s19 + $0x8] sm:$0xff]  ;;  %v689_v4 = vld [vmem:[%s139_s19 + $0x10] sm:$0xff] }
   0xf   : > { %v692_v5 = vld [vmem:[%s139_s19 + $0x28] sm:$0xff]  ;;  %v690_v9 = vld [vmem:[%s139_s19 + $0x18] sm:$0xff]  ;;  %v693_v11 = vld [vmem:[%s139_s19 + $0x30] sm:$0xff] }
  0x10   : > { %255 = vmatpush.bf16.msra.mxu0 %v695_v1  ;;  %706 = vmatpush.bf16.msra.mxu3 %v695_v1  ;;  %v691_v12 = vld [vmem:[%s139_s19 + $0x20] sm:$0xff]  ;;  %v694_v13 = vld [vmem:[%s139_s19 + $0x38] sm:$0xff]  ;;  %v168_v18 = vld [vmem:[%s888_s1 + $0x10] sm:$0x1] }
  0x11   : > { %389 = vmatpush.bf16.msra.mxu1 %v703_v7  ;;  %708 = vmatpush.bf16.msra.mxu2 %v703_v7  ;;  %v697_v17 = vld [vmem:[%s888_s1 + $0x18] sm:$0xff]  ;;  %v169_v19 = vunpack.c.l.bf16 %v168_v18 }
  0x13   : > { %645 = vmatmul.msk.bf16.vlgmr.msra.gmra.mxu0 %vm223_vm0, %v687_v2  ;;  %650 = vmatmul.msk.bf16.vlgmr.msra.gmra.mxu3 %vm223_vm0, %v692_v5  ;;  %v170_v21 = vperm.slane %v169_v19, 0 }
  0x15   : > { %390 = vmatpush.bf16.msra.mxu1 %v702_v8  ;;  %709 = vmatpush.bf16.msra.mxu2 %v702_v8 }
  0x19   : > { %391 = vmatpush.bf16.msra.mxu1 %v701_v10  ;;  %710 = vmatpush.bf16.msra.mxu2 %v701_v10 }
  0x1d   : > { %392 = vmatpush.bf16.msra.mxu1 %v700_v14  ;;  %711 = vmatpush.bf16.msra.mxu2 %v700_v14 }
  0x21   : > { %393 = vmatpush.bf16.msra.mxu1 %v699_v15  ;;  %712 = vmatpush.bf16.msra.mxu2 %v699_v15  ;;  %v453_v15 = vld [vmem:[%s888_s1 + $0x60] sm:$0x1] }
  0x23   : > { %646 = vmatmul.msk.bf16.gmra.mxu0 %vm223_vm0, %v688_v3  ;;  %651 = vmatmul.msk.bf16.gmra.mxu3 %vm223_vm0, %v693_v11 }
  0x25   : > { %394 = vmatpush.bf16.msra.mxu1 %v698_v16  ;;  %713 = vmatpush.bf16.msra.mxu2 %v698_v16 }
  0x29   : > { %395 = vmatpush.bf16.msra.mxu1 %v697_v17  ;;  %714 = vmatpush.bf16.msra.mxu2 %v697_v17  ;;  %v454_v17 = vunpack.c.l.bf16 %v453_v15 }
  0x33   : > { %647 = vmatmul.msk.bf16.gmra.mxu0 %vm223_vm0, %v689_v4  ;;  %652 = vmatmul.msk.bf16.gmra.mxu3 %vm223_vm0, %v694_v13  ;;  %v337_v13 = vld [vmem:[%s888_s1 + $0x58] sm:$0x1] }
  0x34   : > { %v338_v14 = vunpack.c.l.bf16 %v337_v13 }
  0x36   : > { %v807_v16 = vperm.slane %v338_v14, 0 }
  0x43   : > { %648 = vmatmul.msk.bf16.gmra.mxu0 %vm223_vm0, %v690_v9 }
  0x53   : > { %649 = vmatmul.msk.bf16.gmra.mxu0 %vm223_vm0, %v691_v12 }
  0x90   : > { %v257_v20 = vpop.f32.mrf.mxu0 }
  0x91   : > { %v258_v22 = vadd.f32 %v257_v20, %v170_v21  ;;  %v810_v20 = vperm.slane %v454_v17, 0 }
  0x93   : > { %v297_v25 = vmax.f32 %v258_v22, 0.0 }
  0x96   : > { %v282_v50 = vpop.f32.mrf.mxu3 }
  0x97   : > { %v283_v59 = vadd.f32 %v282_v50, %v170_v21 }
  0x98   : > { %v259_v23 = vpop.f32.mrf.mxu0 }
  0x99   : > { %v260_v24 = vadd.f32 %v259_v23, %v170_v21  ;;  %v307_v61 = vmax.f32 %v283_v59, 0.0 }
  0x9b   : > { %v298_v26 = vmax.f32 %v260_v24, 0.0 }
  0x9d   : > { %v329_v27 = vpack.c.bf16 %v298_v26, %v297_v25 }
  0x9e   : > { %v284_v54 = vpop.f32.mrf.mxu3 }
  0x9f   : > { %396 = vmatmul.bf16.vlgmr.msra.gmra.mxu1 %v329_v27  ;;  %v285_v60 = vadd.f32 %v284_v54, %v170_v21 }
  0xa0   : > { %v262_v28 = vpop.f32.mrf.mxu0 }
  0xa1   : > { %v263_v29 = vadd.f32 %v262_v28, %v170_v21  ;;  %v308_v62 = vmax.f32 %v285_v60, 0.0 }
  0xa3   : > { %v299_v32 = vmax.f32 %v263_v29, 0.0  ;;  %v334_v63 = vpack.c.bf16 %v308_v62, %v307_v61 }
  0xa6   : > { %v287_v58 = vpop.f32.mrf.mxu3 }
  0xa7   : > { %v288_v1 = vadd.f32 %v287_v58, %v170_v21 }
  0xa8   : > { %v264_v30 = vpop.f32.mrf.mxu0 }
  0xa9   : > { %v265_v31 = vadd.f32 %v264_v30, %v170_v21  ;;  %v309_v4 = vmax.f32 %v288_v1, 0.0 }
  0xab   : > { %v300_v33 = vmax.f32 %v265_v31, 0.0 }
  0xad   : > { %v330_v34 = vpack.c.bf16 %v300_v33, %v299_v32 }
  0xae   : > { %v289_v0 = vpop.f32.mrf.mxu3 }
  0xaf   : > { %401 = vmatmul.bf16.gmra.mxu1 %v330_v34  ;;  %v290_v2 = vadd.f32 %v289_v0, %v170_v21 }
  0xb0   : > { %v267_v35 = vpop.f32.mrf.mxu0 }
  0xb1   : > { %v268_v36 = vadd.f32 %v267_v35, %v170_v21  ;;  %v310_v5 = vmax.f32 %v290_v2, 0.0 }
  0xb3   : > { %v301_v39 = vmax.f32 %v268_v36, 0.0  ;;  %v335_v6 = vpack.c.bf16 %v310_v5, %v309_v4 }
  0xb6   : > { %v292_v3 = vpop.f32.mrf.mxu3 }
  0xb7   : > { %v293_v8 = vadd.f32 %v292_v3, %v170_v21 }
  0xb8   : > { %v269_v37 = vpop.f32.mrf.mxu0 }
  0xb9   : > { %v270_v38 = vadd.f32 %v269_v37, %v170_v21  ;;  %v311_v10 = vmax.f32 %v293_v8, 0.0 }
  0xbb   : > { %v302_v40 = vmax.f32 %v270_v38, 0.0 }
  0xbd   : > { %v331_v41 = vpack.c.bf16 %v302_v40, %v301_v39 }
  0xbe   : > { %v294_v7 = vpop.f32.mrf.mxu3 }
  0xbf   : > { %406 = vmatmul.bf16.gmra.mxu1 %v331_v41  ;;  %v295_v9 = vadd.f32 %v294_v7, %v170_v21 }
  0xc0   : > { %v272_v42 = vpop.f32.mrf.mxu0 }
  0xc1   : > { %v273_v43 = vadd.f32 %v272_v42, %v170_v21  ;;  %v312_v11 = vmax.f32 %v295_v9, 0.0  ;;  %v504_v9 = vld [vmem:[%s888_s1 + $0x68] sm:$0x1] }
  0xc3   : > { %v303_v46 = vmax.f32 %v273_v43, 0.0  ;;  %v336_v12 = vpack.c.bf16 %v312_v11, %v311_v10 }
  0xc8   : > { %v274_v44 = vpop.f32.mrf.mxu0 }
  0xc9   : > { %v275_v45 = vadd.f32 %v274_v44, %v170_v21 }
  0xcb   : > { %v304_v47 = vmax.f32 %v275_v45, 0.0 }
  0xcd   : > { %v332_v48 = vpack.c.bf16 %v304_v47, %v303_v46 }
  0xcf   : > { %411 = vmatmul.bf16.gmra.mxu1 %v332_v48 }
  0xd0   : > { %v277_v49 = vpop.f32.mrf.mxu0 }
  0xd1   : > { %v278_v51 = vadd.f32 %v277_v49, %v170_v21 }
  0xd3   : > { %v305_v55 = vmax.f32 %v278_v51, 0.0 }
  0xd8   : > { %v279_v52 = vpop.f32.mrf.mxu0 }
  0xd9   : > { %v280_v53 = vadd.f32 %v279_v52, %v170_v21 }
  0xdb   : > { %v306_v56 = vmax.f32 %v280_v53, 0.0 }
  0xdd   : > { %v333_v57 = vpack.c.bf16 %v306_v56, %v305_v55 }
  0xdf   : > { %416 = vmatmul.bf16.vlgmr.msra.gmra.mxu2 %v333_v57 }
  0xef   : > { %421 = vmatmul.bf16.gmra.mxu2 %v334_v63 }
  0xff   : > { %426 = vmatmul.bf16.gmra.mxu2 %v335_v6 }
 0x10f   : > { %431 = vmatmul.bf16.gmra.mxu2 %v336_v12  ;;  %v505_v12 = vunpack.c.l.bf16 %v504_v9 }
 0x111   : > { %v506_v15 = vperm.slane %v505_v12, 0 }
 0x11c   : > { %v397_v18 = vpop.f32.mrf.mxu1 }
 0x11d   : > { %v398_v19 = vadd.f32 %v397_v18, %v807_v16 }
 0x11f   : > { %v437_v21 = vmax.f32 %v398_v19, 0.0 }
 0x121   : > { %v456_v22 = vmul.f32 %v810_v20, %v437_v21 }
 0x123   : > { %472 = vadd.xlane.f32.xlu0 %v456_v22 }
 0x124   : > { %v399_v23 = vpop.f32.mrf.mxu1 }
 0x125   : > { %v400_v24 = vadd.f32 %v399_v23, %v807_v16 }
 0x127   : > { %v438_v25 = vmax.f32 %v400_v24, 0.0 }
 0x129   : > { %v457_v26 = vmul.f32 %v810_v20, %v438_v25 }
 0x12b   : > { %474 = vadd.xlane.f32.xlu0 %v457_v26 }
 0x12c   : > { %v402_v27 = vpop.f32.mrf.mxu1 }
 0x12d   : > { %v403_v28 = vadd.f32 %v402_v27, %v807_v16 }
 0x12f   : > { %v439_v29 = vmax.f32 %v403_v28, 0.0 }
 0x131   : > { %v458_v30 = vmul.f32 %v810_v20, %v439_v29 }
 0x133   : > { %476 = vadd.xlane.f32.xlu1 %v458_v30 }
 0x134   : > { %v404_v31 = vpop.f32.mrf.mxu1 }
 0x135   : > { %v405_v32 = vadd.f32 %v404_v31, %v807_v16 }
 0x137   : > { %v440_v33 = vmax.f32 %v405_v32, 0.0 }
 0x139   : > { %v459_v34 = vmul.f32 %v810_v20, %v440_v33 }
 0x13b   : > { %478 = vadd.xlane.f32.xlu1 %v459_v34 }
 0x13c   : > { %v407_v35 = vpop.f32.mrf.mxu1 }
 0x13d   : > { %v408_v36 = vadd.f32 %v407_v35, %v807_v16 }
 0x13f   : > { %v441_v37 = vmax.f32 %v408_v36, 0.0 }
 0x141   : > { %v460_v38 = vmul.f32 %v810_v20, %v441_v37 }
 0x143   : > { %480 = vadd.xlane.f32.xlu2 %v460_v38 }
 0x144   : > { %v409_v39 = vpop.f32.mrf.mxu1 }
 0x145   : > { %v410_v40 = vadd.f32 %v409_v39, %v807_v16 }
 0x147   : > { %v442_v41 = vmax.f32 %v410_v40, 0.0 }
 0x149   : > { %v461_v42 = vmul.f32 %v810_v20, %v442_v41 }
 0x14b   : > { %482 = vadd.xlane.f32.xlu2 %v461_v42 }
 0x14c   : > { %v412_v43 = vpop.f32.mrf.mxu1 }
 0x14d   : > { %v413_v44 = vadd.f32 %v412_v43, %v807_v16 }
 0x14f   : > { %v443_v45 = vmax.f32 %v413_v44, 0.0 }
 0x151   : > { %v462_v46 = vmul.f32 %v810_v20, %v443_v45 }
 0x153   : > { %484 = vadd.xlane.f32.xlu0 %v462_v46 }
 0x154   : > { %v414_v47 = vpop.f32.mrf.mxu1 }
 0x155   : > { %v415_v48 = vadd.f32 %v414_v47, %v807_v16 }
 0x157   : > { %v444_v49 = vmax.f32 %v415_v48, 0.0 }
 0x159   : > { %v463_v50 = vmul.f32 %v810_v20, %v444_v49 }
 0x15b   : > { %486 = vadd.xlane.f32.xlu1 %v463_v50 }
 0x162   : > { %v417_v51 = vpop.f32.mrf.mxu2 }
 0x163   : > { %v418_v52 = vadd.f32 %v417_v51, %v807_v16 }
 0x165   : > { %v445_v53 = vmax.f32 %v418_v52, 0.0 }
 0x167   : > { %v464_v54 = vmul.f32 %v810_v20, %v445_v53 }
 0x169   : > { %488 = vadd.xlane.f32.xlu2 %v464_v54 }
 0x16a   : > { %v419_v55 = vpop.f32.mrf.mxu2 }
 0x16b   : > { %v420_v56 = vadd.f32 %v419_v55, %v807_v16 }
 0x16d   : > { %v446_v57 = vmax.f32 %v420_v56, 0.0 }
 0x16f   : > { %v465_v58 = vmul.f32 %v810_v20, %v446_v57 }
 0x171   : > { %490 = vadd.xlane.f32.xlu0 %v465_v58 }
 0x172   : > { %v422_v59 = vpop.f32.mrf.mxu2 }
 0x173   : > { %v423_v60 = vadd.f32 %v422_v59, %v807_v16 }
 0x175   : > { %v447_v61 = vmax.f32 %v423_v60, 0.0 }
 0x177   : > { %v466_v62 = vmul.f32 %v810_v20, %v447_v61 }
 0x179   : > { %492 = vadd.xlane.f32.xlu1 %v466_v62 }
 0x17a   : > { %v424_v63 = vpop.f32.mrf.mxu2 }
 0x17b   : > { %v425_v0 = vadd.f32 %v424_v63, %v807_v16 }
 0x17d   : > { %v448_v1 = vmax.f32 %v425_v0, 0.0 }
 0x17f   : > { %v467_v2 = vmul.f32 %v810_v20, %v448_v1 }
 0x181   : > { %494 = vadd.xlane.f32.xlu2 %v467_v2 }
 0x182   : > { %v427_v3 = vpop.f32.mrf.mxu2 }
 0x183   : > { %v428_v4 = vadd.f32 %v427_v3, %v807_v16 }
 0x185   : > { %v449_v5 = vmax.f32 %v428_v4, 0.0 }
 0x187   : > { %v468_v6 = vmul.f32 %v810_v20, %v449_v5 }
 0x189   : > { %496 = vadd.xlane.f32.xlu0 %v468_v6 }
 0x18a   : > { %v429_v7 = vpop.f32.mrf.mxu2 }
 0x18b   : > { %v430_v8 = vadd.f32 %v429_v7, %v807_v16 }
 0x18d   : > { %v450_v10 = vmax.f32 %v430_v8, 0.0 }
 0x18f   : > { %v469_v11 = vmul.f32 %v810_v20, %v450_v10 }
 0x191   : > { %498 = vadd.xlane.f32.xlu1 %v469_v11 }
 0x192   : > { %v432_v13 = vpop.f32.mrf.mxu2 }
 0x193   : > { %v433_v14 = vadd.f32 %v432_v13, %v807_v16 }
 0x195   : > { %v451_v17 = vmax.f32 %v433_v14, 0.0 }
 0x196   : > { %v473_v18 = vpop.xlane.xlu0 %472 }
 0x197   : > { %v507_v19 = vadd.f32 %v506_v15, %v473_v18  ;;  %v470_v21 = vmul.f32 %v810_v20, %v451_v17 }
 0x199   : > { %524 = vst.msk [vmem:[%s847_s21] sm:$0xff] %vm523_vm1, %v507_v19  ;;  %500 = vadd.xlane.f32.xlu2 %v470_v21 }
 0x19a   : > { %v434_v22 = vpop.f32.mrf.mxu2 }
 0x19b   : > { %v435_v23 = vadd.f32 %v434_v22, %v807_v16 }
 0x19d   : > { %v452_v24 = vmax.f32 %v435_v23, 0.0 }
 0x19e   : > { %v475_v25 = vpop.xlane.xlu0 %474 }
 0x19f   : > { %v508_v26 = vadd.f32 %v506_v15, %v475_v25  ;;  %v471_v27 = vmul.f32 %v810_v20, %v452_v24 }
 0x1a1   : > { %525 = vst.msk [vmem:[%s847_s21 + $0x8] sm:$0xff] %vm523_vm1, %v508_v26  ;;  %502 = vadd.xlane.f32.xlu0 %v471_v27 }
 0x1a6   : > { %v477_v28 = vpop.xlane.xlu1 %476 }
 0x1a7   : > { %v509_v29 = vadd.f32 %v506_v15, %v477_v28 }
 0x1a9   : > { %526 = vst.msk [vmem:[%s847_s21 + $0x10] sm:$0xff] %vm523_vm1, %v509_v29 }
 0x1ae   : > { %v479_v30 = vpop.xlane.xlu1 %478 }
 0x1af   : > { %v510_v31 = vadd.f32 %v506_v15, %v479_v30 }
 0x1b1   : > { %527 = vst.msk [vmem:[%s847_s21 + $0x18] sm:$0xff] %vm523_vm1, %v510_v31 }
 0x1b6   : > { %v481_v16 = vpop.xlane.xlu2 %480 }
 0x1b7   : > { %v511_v32 = vadd.f32 %v506_v15, %v481_v16 }
 0x1b9   : > { %528 = vst.msk [vmem:[%s847_s21 + $0x20] sm:$0xff] %vm523_vm1, %v511_v32 }
 0x1be   : > { %v483_v20 = vpop.xlane.xlu2 %482 }
 0x1bf   : > { %v512_v33 = vadd.f32 %v506_v15, %v483_v20 }
 0x1c1   : > { %529 = vst.msk [vmem:[%s847_s21 + $0x28] sm:$0xff] %vm523_vm1, %v512_v33 }
 0x1c6   : > { %v485_v34 = vpop.xlane.xlu0 %484 }
 0x1c7   : > { %v513_v35 = vadd.f32 %v506_v15, %v485_v34 }
 0x1c9   : > { %530 = vst.msk [vmem:[%s847_s21 + $0x30] sm:$0xff] %vm523_vm1, %v513_v35 }
 0x1ce   : > { %v487_v36 = vpop.xlane.xlu1 %486 }
 0x1cf   : > { %v514_v37 = vadd.f32 %v506_v15, %v487_v36 }
 0x1d1   : > { %531 = vst.msk [vmem:[%s847_s21 + $0x38] sm:$0xff] %vm523_vm1, %v514_v37 }
 0x1dc   : > { %v489_v38 = vpop.xlane.xlu2 %488 }
 0x1dd   : > { %v515_v39 = vadd.f32 %v506_v15, %v489_v38 }
 0x1df   : > { %532 = vst.msk [vmem:[%s847_s21 + $0x40] sm:$0xff] %vm523_vm1, %v515_v39 }
 0x1e4   : > { %v491_v40 = vpop.xlane.xlu0 %490 }
 0x1e5   : > { %v516_v41 = vadd.f32 %v506_v15, %v491_v40 }
 0x1e7   : > { %533 = vst.msk [vmem:[%s847_s21 + $0x48] sm:$0xff] %vm523_vm1, %v516_v41 }
 0x1ec   : > { %v493_v42 = vpop.xlane.xlu1 %492 }
 0x1ed   : > { %v517_v43 = vadd.f32 %v506_v15, %v493_v42 }
 0x1ef   : > { %534 = vst.msk [vmem:[%s847_s21 + $0x50] sm:$0xff] %vm523_vm1, %v517_v43 }
 0x1f4   : > { %v495_v44 = vpop.xlane.xlu2 %494 }
 0x1f5   : > { %v518_v45 = vadd.f32 %v506_v15, %v495_v44 }
 0x1f7   : > { %535 = vst.msk [vmem:[%s847_s21 + $0x58] sm:$0xff] %vm523_vm1, %v518_v45 }
 0x1fc   : > { %v497_v46 = vpop.xlane.xlu0 %496 }
 0x1fd   : > { %v519_v47 = vadd.f32 %v506_v15, %v497_v46 }
 0x1ff   : > { %536 = vst.msk [vmem:[%s847_s21 + $0x60] sm:$0xff] %vm523_vm1, %v519_v47 }
 0x204   : > { %v499_v48 = vpop.xlane.xlu1 %498 }
 0x205   : > { %v520_v49 = vadd.f32 %v506_v15, %v499_v48 }
 0x207   : > { %537 = vst.msk [vmem:[%s847_s21 + $0x68] sm:$0xff] %vm523_vm1, %v520_v49 }
 0x20c   : > { %v501_v50 = vpop.xlane.xlu2 %500 }
 0x20d   : > { %v521_v51 = vadd.f32 %v506_v15, %v501_v50 }
 0x20f   : > { %538 = vst.msk [vmem:[%s847_s21 + $0x70] sm:$0xff] %vm523_vm1, %v521_v51 }
 0x214   : > { %v503_v52 = vpop.xlane.xlu0 %502 }
 0x215   : > { %v522_v53 = vadd.f32 %v506_v15, %v503_v52 }
 0x217   : > { %539 = vst.msk [vmem:[%s847_s21 + $0x78] sm:$0xff] %vm523_vm1, %v522_v53 }
 0x218 PF: > { %s12_s9 = sadd.s32 1, %s729_s9  }
 0x219   : > { %p9_p4 = scmp.ge.s32.totalorder %s12_s9, 4  }
 0x21b   :  { %11 = sbr.rel (!%p9_p4) target bundleno = 1 (0x1), region = 58 }

</bundles_post_ra>
